<compile_context>
chip_gen: v7x
topology: tpu7x:2x2x1
jax: 0.10.0
libtpu: 0.0.40
codegen_flags: <defaults>
</compile_context>

<pallas_src>
import jax
import jax.numpy as jnp
from jax.experimental import pallas as pl
from jax.experimental.pallas import tpu as pltpu

BN_EPS = 1e-5
DEFAULT_BATCH_TILE = 4096     # large tiles amortize the ~0.35 us per-step overhead
ALIGN = 16                    # bf16 sublane packing: keep batch tiles multiples of 16
VMEM_WORKING_BUDGET = 40 * 1024 * 1024   # fits v7x's 64 MiB VMEM with headroom
VMEM_LIMIT_CAP = 48 * 1024 * 1024        # safe explicit limit on v5e/v6e/v7x


def _round_up(n, m):
    return ((n + m - 1) // m) * m


# ----------------------------------------------------------------------------
# Kernel: fused 4-layer MLP on one batch tile (BN already folded into fc_1).
# ----------------------------------------------------------------------------
def nn_para_kernel(x_ref, w1_ref, b1_ref, w2_ref, b2_ref,
                   w3_ref, b3_ref, w4_ref, b4_ref, o_ref):
    # fc_1 (BN folded in) -> ReLU   (bf16 MXU inputs, f32 accumulation)
    h = jnp.dot(x_ref[...], w1_ref[...],
                preferred_element_type=jnp.float32) + b1_ref[...]
    h = jnp.maximum(h, 0.0)
    # fc_2 -> ReLU
    h = jnp.dot(h.astype(jnp.bfloat16), w2_ref[...],
                preferred_element_type=jnp.float32) + b2_ref[...]
    h = jnp.maximum(h, 0.0)
    # fc_3 -> ReLU
    h = jnp.dot(h.astype(jnp.bfloat16), w3_ref[...],
                preferred_element_type=jnp.float32) + b3_ref[...]
    h = jnp.maximum(h, 0.0)
    # fc_4 (no activation) -> narrow (TB, out_dim) store
    o_ref[...] = jnp.dot(h.astype(jnp.bfloat16), w4_ref[...],
                         preferred_element_type=jnp.float32) + b4_ref[...]


# ----------------------------------------------------------------------------
# BN folding helpers (shared by the wrapper and the matched reference).
# ----------------------------------------------------------------------------
def _bn_stats_one_pass(x):
    mean = jnp.mean(x, axis=0, keepdims=True)
    m2 = jnp.mean(x * x, axis=0, keepdims=True)
    var = jnp.maximum(m2 - mean * mean, 0.0)     # biased batch variance
    return mean, var


def _fold_bn_into_fc1(x, gamma, beta, w1, b1):
    mean, var = _bn_stats_one_pass(x)
    scale = gamma * jax.lax.rsqrt(var + BN_EPS)          # (1, D)
    shift = beta - mean * scale                          # (1, D)
    w1f = w1 * scale.reshape(-1, 1)                      # (D, 128), f32
    b1f = b1 + shift @ w1                                # (1, 128), f32
    return w1f, b1f


def _choose_batch_tile(B, input_dim, out_dim, batch_tile):
    # per-row VMEM bytes of the pipelined working set:
    per_row = (2 * input_dim * 2          # x tile (bf16), double-buffered
               + 2 * out_dim * 4          # out tile (f32), double-buffered
               + (128 + 64 + 32) * 6)     # f32 intermediates + bf16 MXU copies
    cap = max(ALIGN, (VMEM_WORKING_BUDGET // per_row) // ALIGN * ALIGN)
    tb = _round_up(min(batch_tile, max(B, 1)), ALIGN)
    tb = min(tb, cap)
    # v7x has 2 TensorCores that share work along the "parallel" batch axis:
    # keep at least 2 grid steps whenever the batch is big enough.
    if B >= 2 * ALIGN and tb >= B:
        tb = _round_up(-(-B // 2), ALIGN)
    return tb, per_row


# ----------------------------------------------------------------------------
# Wrapper.
# ----------------------------------------------------------------------------
def nn_para_forward(x, params, *, batch_tile=DEFAULT_BATCH_TILE):
    """Forward pass of NN_para (BatchNorm1d in training-mode semantics)."""
    (gamma, beta, w1, b1, w2, b2, w3, b3, w4, b4) = params
    x = x.astype(jnp.float32)
    B, input_dim = x.shape
    out_dim = w4.shape[1]

    gamma = jnp.reshape(gamma, (1, -1)).astype(jnp.float32)
    beta = jnp.reshape(beta, (1, -1)).astype(jnp.float32)
    b1 = jnp.reshape(b1, (1, -1)).astype(jnp.float32)
    b2 = jnp.reshape(b2, (1, -1)).astype(jnp.float32)
    b3 = jnp.reshape(b3, (1, -1)).astype(jnp.float32)
    b4 = jnp.reshape(b4, (1, -1)).astype(jnp.float32)

    # ---- one-pass BN stats over the FULL batch, folded into fc_1 ----
    w1f, b1f = _fold_bn_into_fc1(x, gamma, beta, w1, b1)

    # bf16 weights + bf16 activations into the MXU; biases stay f32.
    w1b = w1f.astype(jnp.bfloat16)
    w2b = w2.astype(jnp.bfloat16)
    w3b = w3.astype(jnp.bfloat16)
    w4b = w4.astype(jnp.bfloat16)
    xb = x.astype(jnp.bfloat16)

    # ---- batch tiling ----
    TB, per_row = _choose_batch_tile(B, input_dim, out_dim, batch_tile)
    Bp = _round_up(B, TB)
    if Bp != B:
        # Padded rows never touch the (already hoisted) BN stats and are
        # sliced off the output below.
        xb = jnp.pad(xb, ((0, Bp - B), (0, 0)))
    grid = (Bp // TB,)

    vmem_limit = int(min(VMEM_LIMIT_CAP,
                         max(32 * 1024 * 1024, 2 * per_row * TB)))

    def tile_map(i):
        return (i, 0)

    def pinned(shape):
        # weight / bias tiles: same block every grid step -> stays
        # VMEM-resident across the whole grid.
        return pl.BlockSpec(shape, lambda i: (0,) * len(shape))

    in_specs = [
        pl.BlockSpec((TB, input_dim), tile_map),      # x (bf16, tiled over batch)
        pinned(w1b.shape), pinned(b1f.shape),
        pinned(w2b.shape), pinned(b2.shape),
        pinned(w3b.shape), pinned(b3.shape),
        pinned(w4b.shape), pinned(b4.shape),
    ]

    out_padded = pl.pallas_call(
        nn_para_kernel,
        out_shape=jax.ShapeDtypeStruct((Bp, out_dim), jnp.float32),
        grid=grid,
        in_specs=in_specs,
        # narrow, full-extent last dim: only out_dim floats per row hit HBM
        out_specs=pl.BlockSpec((TB, out_dim), tile_map),
        compiler_params=pltpu.CompilerParams(
            dimension_semantics=("parallel",),        # megacore / 2-TC sharding
            vmem_limit_bytes=vmem_limit,
        ),
    )(xb, w1b, b1f, w2b, b2, w3b, b3, w4b, b4)

    out = out_padded[:B]
    # torch.squeeze(out, dim=1): only squeezes if output_dim == 1
    if out_dim == 1:
        out = jnp.squeeze(out, axis=1)
    return out


# ----------------------------------------------------------------------------
# Parameter init + references.
# ----------------------------------------------------------------------------
def init_params(key, input_dim, output_dim):
    """Deterministic synthetic parameters (shapes match the nn.Linear layers)."""
    dims = [(input_dim, 128), (128, 64), (64, 32), (32, output_dim)]
    params = []
    # BatchNorm1d affine params: gamma=1, beta=0 (PyTorch defaults)
    params.append(jnp.ones((1, input_dim), jnp.float32))    # gamma
    params.append(jnp.zeros((1, input_dim), jnp.float32))   # beta
    for (fan_in, fan_out) in dims:
        key, kw, kb = jax.random.split(key, 3)
        bound = 1.0 / jnp.sqrt(fan_in)
        w = jax.random.uniform(kw, (fan_in, fan_out), jnp.float32, -bound, bound)
        b = jax.random.uniform(kb, (1, fan_out), jnp.float32, -bound, bound)
        params.append(w)
        params.append(b)
    return tuple(params)


def reference_forward_f32(x, params):
    """Pure-f32 JAX reference (module semantics, two-pass stats)."""
    (gamma, beta, w1, b1, w2, b2, w3, b3, w4, b4) = params
    mean = jnp.mean(x, axis=0, keepdims=True)
    var = jnp.mean((x - mean) ** 2, axis=0, keepdims=True)
    xn = (x - mean) / jnp.sqrt(var + BN_EPS) * gamma + beta
    h = jax.nn.relu(xn @ w1 + b1)
    h = jax.nn.relu(h @ w2 + b2)
    h = jax.nn.relu(h @ w3 + b3)
    out = h @ w4 + b4
    if out.shape[1] == 1:
        out = jnp.squeeze(out, axis=1)
    return out


def reference_forward_matched(x, params):
    """Reference matching the kernel arithmetic (BN folded, bf16 MXU, f32 acc)."""
    (gamma, beta, w1, b1, w2, b2, w3, b3, w4, b4) = params
    x = x.astype(jnp.float32)
    w1f, b1f = _fold_bn_into_fc1(x, gamma, beta, w1, b1)

    def mm(a, w):
        return jnp.dot(a.astype(jnp.bfloat16), w.astype(jnp.bfloat16),
                       preferred_element_type=jnp.float32)

    h = jax.nn.relu(mm(x, w1f) + b1f)
    h = jax.nn.relu(mm(h, w2) + b2)
    h = jax.nn.relu(mm(h, w3) + b3)
    out = mm(h, w4) + b4
    if out.shape[1] == 1:
        out = jnp.squeeze(out, axis=1)
    return out


if __name__ == "__main__":
    key = jax.random.PRNGKey(0)

    # --- main small check (single tile) ---
    B, input_dim, output_dim = 8, 32, 4
    key, kx = jax.random.split(key)
    x = jax.random.normal(kx, (B, input_dim), jnp.float32)
    params = init_params(key, input_dim, output_dim)

    out = jax.block_until_ready(nn_para_forward(x, params))
    assert out.shape == (B, output_dim), out.shape
    ref_m = reference_forward_matched(x, params)
    ref_f32 = reference_forward_f32(x, params)
    assert jnp.allclose(out, ref_m, atol=1e-3, rtol=1e-3), "mismatch vs matched reference"
    assert jnp.allclose(out, ref_f32, atol=5e-2, rtol=5e-2), "mismatch vs f32 reference"

    # --- multi-tile + ragged-batch check (grid > 1, padded last tile) ---
    B2 = 200
    key, kx2 = jax.random.split(key)
    x2 = jax.random.normal(kx2, (B2, input_dim), jnp.float32)
    out2 = jax.block_until_ready(nn_para_forward(x2, params, batch_tile=64))
    assert out2.shape == (B2, output_dim), out2.shape
    ref2 = reference_forward_matched(x2, params)
    assert jnp.allclose(out2, ref2, atol=1e-3, rtol=1e-3), "mismatch (tiled) vs matched reference"

    # --- output_dim == 1 check (squeeze path, auto grid>=2 clamp) ---
    key, kp1, kx3 = jax.random.split(key, 3)
    params1 = init_params(kp1, input_dim, 1)
    B3 = 40
    x3 = jax.random.normal(kx3, (B3, input_dim), jnp.float32)
    out3 = jax.block_until_ready(nn_para_forward(x3, params1))
    assert out3.shape == (B3,), out3.shape
    ref3 = reference_forward_matched(x3, params1)
    assert jnp.allclose(out3, ref3, atol=1e-3, rtol=1e-3), "mismatch (out_dim=1) vs matched reference"

    print("KERNEL_OK")
</pallas_src>

<mosaic_0001>
module attributes {stable_mosaic.version = 11 : i64} {
  func.func @nn_para_kernel(%arg0: i32, %arg1: memref<16x32xbf16, #tpu.memory_space<vmem>>, %arg2: memref<32x128xbf16, #tpu.memory_space<vmem>>, %arg3: memref<1x128xf32, #tpu.memory_space<vmem>>, %arg4: memref<128x64xbf16, #tpu.memory_space<vmem>>, %arg5: memref<1x64xf32, #tpu.memory_space<vmem>>, %arg6: memref<64x32xbf16, #tpu.memory_space<vmem>>, %arg7: memref<1x32xf32, #tpu.memory_space<vmem>>, %arg8: memref<32x4xbf16, #tpu.memory_space<vmem>>, %arg9: memref<1x4xf32, #tpu.memory_space<vmem>>, %arg10: memref<16x4xf32, #tpu.memory_space<vmem>>) attributes {dimension_semantics = [#tpu.dimension_semantics<parallel>], iteration_bounds = array<i64: 1>, scalar_prefetch = 0 : i64, scratch_operands = 0 : i64, tpu.core_type = #tpu.core_type<tc>, window_params = [{transform_indices = @transform_0, window_bounds = array<i64: 16, 32>}, {pipeline_mode = #tpu.pipeline_mode<synchronous>, transform_indices = @transform_1, window_bounds = array<i64: 32, 128>}, {pipeline_mode = #tpu.pipeline_mode<synchronous>, transform_indices = @transform_2, window_bounds = array<i64: 1, 128>}, {pipeline_mode = #tpu.pipeline_mode<synchronous>, transform_indices = @transform_3, window_bounds = array<i64: 128, 64>}, {pipeline_mode = #tpu.pipeline_mode<synchronous>, transform_indices = @transform_4, window_bounds = array<i64: 1, 64>}, {pipeline_mode = #tpu.pipeline_mode<synchronous>, transform_indices = @transform_5, window_bounds = array<i64: 64, 32>}, {pipeline_mode = #tpu.pipeline_mode<synchronous>, transform_indices = @transform_6, window_bounds = array<i64: 1, 32>}, {pipeline_mode = #tpu.pipeline_mode<synchronous>, transform_indices = @transform_7, window_bounds = array<i64: 32, 4>}, {pipeline_mode = #tpu.pipeline_mode<synchronous>, transform_indices = @transform_8, window_bounds = array<i64: 1, 4>}, {transform_indices = @transform_9, window_bounds = array<i64: 16, 4>}]} {
    %c0 = arith.constant 0 : index
    %c0_0 = arith.constant 0 : index
    %0 = vector.load %arg1[%c0, %c0_0] : memref<16x32xbf16, #tpu.memory_space<vmem>>, vector<16x32xbf16>
    %c0_1 = arith.constant 0 : index
    %c0_2 = arith.constant 0 : index
    %1 = vector.load %arg2[%c0_1, %c0_2] : memref<32x128xbf16, #tpu.memory_space<vmem>>, vector<32x128xbf16>
    %cst = arith.constant dense<0.000000e+00> : vector<16x128xf32>
    %2 = tpu.matmul %0, %1, %cst {dimension_numbers = #tpu.dot_dimension_numbers<[1], [0], [0], [1], [0, 0, 1, 1], [], []>} : vector<16x32xbf16>, vector<32x128xbf16>, vector<16x128xf32> -> vector<16x128xf32>
    %c0_3 = arith.constant 0 : index
    %c0_4 = arith.constant 0 : index
    %3 = vector.load %arg3[%c0_3, %c0_4] : memref<1x128xf32, #tpu.memory_space<vmem>>, vector<1x128xf32>
    %4 = vector.broadcast %3 : vector<1x128xf32> to vector<16x128xf32>
    %5 = arith.addf %2, %4 : vector<16x128xf32>
    %cst_5 = arith.constant 0.000000e+00 : f32
    %6 = vector.broadcast %cst_5 : f32 to vector<16x128xf32>
    %7 = arith.maximumf %5, %6 : vector<16x128xf32>
    %8 = arith.truncf %7 : vector<16x128xf32> to vector<16x128xbf16>
    %c0_6 = arith.constant 0 : index
    %c0_7 = arith.constant 0 : index
    %9 = vector.load %arg4[%c0_6, %c0_7] : memref<128x64xbf16, #tpu.memory_space<vmem>>, vector<128x64xbf16>
    %cst_8 = arith.constant dense<0.000000e+00> : vector<16x64xf32>
    %10 = tpu.matmul %8, %9, %cst_8 {dimension_numbers = #tpu.dot_dimension_numbers<[1], [0], [0], [1], [0, 0, 1, 1], [], []>} : vector<16x128xbf16>, vector<128x64xbf16>, vector<16x64xf32> -> vector<16x64xf32>
    %c0_9 = arith.constant 0 : index
    %c0_10 = arith.constant 0 : index
    %11 = vector.load %arg5[%c0_9, %c0_10] : memref<1x64xf32, #tpu.memory_space<vmem>>, vector<1x64xf32>
    %12 = vector.broadcast %11 : vector<1x64xf32> to vector<16x64xf32>
    %13 = arith.addf %10, %12 : vector<16x64xf32>
    %cst_11 = arith.constant 0.000000e+00 : f32
    %14 = vector.broadcast %cst_11 : f32 to vector<16x64xf32>
    %15 = arith.maximumf %13, %14 : vector<16x64xf32>
    %16 = arith.truncf %15 : vector<16x64xf32> to vector<16x64xbf16>
    %c0_12 = arith.constant 0 : index
    %c0_13 = arith.constant 0 : index
    %17 = vector.load %arg6[%c0_12, %c0_13] : memref<64x32xbf16, #tpu.memory_space<vmem>>, vector<64x32xbf16>
    %cst_14 = arith.constant dense<0.000000e+00> : vector<16x32xf32>
    %18 = tpu.matmul %16, %17, %cst_14 {dimension_numbers = #tpu.dot_dimension_numbers<[1], [0], [0], [1], [0, 0, 1, 1], [], []>} : vector<16x64xbf16>, vector<64x32xbf16>, vector<16x32xf32> -> vector<16x32xf32>
    %c0_15 = arith.constant 0 : index
    %c0_16 = arith.constant 0 : index
    %19 = vector.load %arg7[%c0_15, %c0_16] : memref<1x32xf32, #tpu.memory_space<vmem>>, vector<1x32xf32>
    %20 = vector.broadcast %19 : vector<1x32xf32> to vector<16x32xf32>
    %21 = arith.addf %18, %20 : vector<16x32xf32>
    %cst_17 = arith.constant 0.000000e+00 : f32
    %22 = vector.broadcast %cst_17 : f32 to vector<16x32xf32>
    %23 = arith.maximumf %21, %22 : vector<16x32xf32>
    %24 = arith.truncf %23 : vector<16x32xf32> to vector<16x32xbf16>
    %c0_18 = arith.constant 0 : index
    %c0_19 = arith.constant 0 : index
    %25 = vector.load %arg8[%c0_18, %c0_19] : memref<32x4xbf16, #tpu.memory_space<vmem>>, vector<32x4xbf16>
    %cst_20 = arith.constant dense<0.000000e+00> : vector<16x4xf32>
    %26 = tpu.matmul %24, %25, %cst_20 {dimension_numbers = #tpu.dot_dimension_numbers<[1], [0], [0], [1], [0, 0, 1, 1], [], []>} : vector<16x32xbf16>, vector<32x4xbf16>, vector<16x4xf32> -> vector<16x4xf32>
    %c0_21 = arith.constant 0 : index
    %c0_22 = arith.constant 0 : index
    %27 = vector.load %arg9[%c0_21, %c0_22] : memref<1x4xf32, #tpu.memory_space<vmem>>, vector<1x4xf32>
    %28 = vector.broadcast %27 : vector<1x4xf32> to vector<16x4xf32>
    %29 = arith.addf %26, %28 : vector<16x4xf32>
    %c0_23 = arith.constant 0 : index
    %c0_24 = arith.constant 0 : index
    %30 = vector.load %arg10[%c0_23, %c0_24] : memref<16x4xf32, #tpu.memory_space<vmem>>, vector<16x4xf32>
    tpu.vector_store %arg10[%c0_23, %c0_24], %29 {strides = array<i32>} : memref<16x4xf32, #tpu.memory_space<vmem>>, vector<16x4xf32>,
    return
  }
  func.func @transform_0(%arg0: i32) -> (i32, i32) {
    %c0_i32 = arith.constant 0 : i32
    %c0_i32_0 = arith.constant 0 : i32
    return %arg0, %c0_i32 : i32, i32
  }
  func.func @transform_1(%arg0: i32) -> (i32, i32) {
    %c0_i32 = arith.constant 0 : i32
    %c0_i32_0 = arith.constant 0 : i32
    %c0_i32_1 = arith.constant 0 : i32
    return %c0_i32, %c0_i32_0 : i32, i32
  }
  func.func @transform_2(%arg0: i32) -> (i32, i32) {
    %c0_i32 = arith.constant 0 : i32
    %c0_i32_0 = arith.constant 0 : i32
    %c0_i32_1 = arith.constant 0 : i32
    return %c0_i32, %c0_i32_0 : i32, i32
  }
  func.func @transform_3(%arg0: i32) -> (i32, i32) {
    %c0_i32 = arith.constant 0 : i32
    %c0_i32_0 = arith.constant 0 : i32
    %c0_i32_1 = arith.constant 0 : i32
    return %c0_i32, %c0_i32_0 : i32, i32
  }
  func.func @transform_4(%arg0: i32) -> (i32, i32) {
    %c0_i32 = arith.constant 0 : i32
    %c0_i32_0 = arith.constant 0 : i32
    %c0_i32_1 = arith.constant 0 : i32
    return %c0_i32, %c0_i32_0 : i32, i32
  }
  func.func @transform_5(%arg0: i32) -> (i32, i32) {
    %c0_i32 = arith.constant 0 : i32
    %c0_i32_0 = arith.constant 0 : i32
    %c0_i32_1 = arith.constant 0 : i32
    return %c0_i32, %c0_i32_0 : i32, i32
  }
  func.func @transform_6(%arg0: i32) -> (i32, i32) {
    %c0_i32 = arith.constant 0 : i32
    %c0_i32_0 = arith.constant 0 : i32
    %c0_i32_1 = arith.constant 0 : i32
    return %c0_i32, %c0_i32_0 : i32, i32
  }
  func.func @transform_7(%arg0: i32) -> (i32, i32) {
    %c0_i32 = arith.constant 0 : i32
    %c0_i32_0 = arith.constant 0 : i32
    %c0_i32_1 = arith.constant 0 : i32
    return %c0_i32, %c0_i32_0 : i32, i32
  }
  func.func @transform_8(%arg0: i32) -> (i32, i32) {
    %c0_i32 = arith.constant 0 : i32
    %c0_i32_0 = arith.constant 0 : i32
    %c0_i32_1 = arith.constant 0 : i32
    return %c0_i32, %c0_i32_0 : i32, i32
  }
  func.func @transform_9(%arg0: i32) -> (i32, i32) {
    %c0_i32 = arith.constant 0 : i32
    %c0_i32_0 = arith.constant 0 : i32
    return %arg0, %c0_i32 : i32, i32
  }
}

</mosaic_0001>

<bundles_post_ra>
// kernel: tpu_custom_call.1
= control target key start
LH: loop header
LB: loop body
LE: loop exit
PB: predicated region body
PF: predicated region fallthrough
CT: control target
= control target key end

     0   :  { %v498_v0 = vmov 0.0   ;;  %vm499_vm0 = vmmov 0   ;;  %vm63_vm1 = vcmask 261120   ;;  %vm265_vm2 = vcmask 523264   ;;  %s645_s1 = inlined_call_operand.vmem [shape: bf16[32,128], index: 1, kind: input, shape index: {}]   ;;  %s646_s3 = inlined_call_operand.vmem [shape: bf16[128,64], index: 3, kind: input, shape index: {}]   ;;  %s647_s0 = inlined_call_operand.vmem [shape: bf16[16,32], index: 0, kind: input, shape index: {}]   ;;  %s648_s5 = inlined_call_operand.vmem [shape: bf16[64,32], index: 5, kind: input, shape index: {}]   ;;  %s649_s2 = inlined_call_operand.vmem [shape: f32[1,128], index: 2, kind: input, shape index: {}]   ;;  %s650_s4 = inlined_call_operand.vmem [shape: f32[1,64], index: 4, kind: input, shape index: {}]   ;;  %s651_s7 = inlined_call_operand.vmem [shape: bf16[32,4], index: 7, kind: input, shape index: {}]   ;;  %s652_s6 = inlined_call_operand.vmem [shape: f32[1,32], index: 6, kind: input, shape index: {}]   ;;  %s653_s8 = inlined_call_operand.vmem [shape: f32[1,4], index: 8, kind: input, shape index: {}]   ;;  %s654_s9 = inlined_call_operand.vmem [shape: f32[16,4], index: 9, kind: output, shape index: {}]  }
   0x1   :  { %431 = vmatprep.subr.bf16.mxu0 %v498_v0  ;;  %v481_v1 = vld [vmem:[%s645_s1] sm:$0xff]   ;;  %435 = vmatprep.mubr.msk.bf16.mxu0 %vm499_vm0, %v498_v0  ;;  %v482_v2 = vld [vmem:[%s645_s1 + $0x8] sm:$0xff]   ;;  %v486_v6 = vld [vmem:[%s646_s3 + $0x10] sm:$0xff]   ;;  %vm380_vm3 = vcmask 31744  }
   0x2   :  { %439 = vmatprep.subr.bf16.mxu1 %v498_v0  ;;  %455 = vmatprep.mubr.msk.bf16.mxu1 %vm499_vm0, %v498_v0  ;;  %v484_v3 = vld [vmem:[%s646_s3] sm:$0xff]   ;;  %v485_v5 = vld [vmem:[%s646_s3 + $0x8] sm:$0xff]   ;;  %v487_v7 = vld [vmem:[%s646_s3 + $0x18] sm:$0xff]  }
   0x3   :  { %432 = vmatpush3.bf16.msra.mxu0 %v481_v1  ;;  %v483_v4 = vld [vmem:[%s647_s0] sm:$0xff]   ;;  %440 = vmatpush3.bf16.msra.mxu1 %v484_v3  ;;  %v489_v9 = vld [vmem:[%s646_s3 + $0x28] sm:$0xff]   ;;  %v490_v10 = vld [vmem:[%s646_s3 + $0x30] sm:$0xff]  }
   0x4   :  { %433 = vmatprep.subr.bf16.mxu0 %v498_v0  ;;  %441 = vmatprep.subr.bf16.mxu1 %v498_v0  ;;  %v488_v8 = vld [vmem:[%s646_s3 + $0x20] sm:$0xff]   ;;  %v491_v11 = vld [vmem:[%s646_s3 + $0x38] sm:$0xff]   ;;  %v493_v13 = vld [vmem:[%s648_s5 + $0x8] sm:$0xff]  }
   0x5   :  { %v492_v12 = vld [vmem:[%s648_s5] sm:$0xff]   ;;  %v494_v24 = vld [vmem:[%s648_s5 + $0x10] sm:$0xff]   ;;  %v495_v25 = vld [vmem:[%s648_s5 + $0x18] sm:$0xff]  }
   0x6   :  { %v387_v14 = vld [vmem:[%s649_s2] ss:$0 sm:$0xff]  ;;  %v497_v37 = vld [vmem:[%s651_s7 + $0x8] sm:$0xff]  }
   0x7   :  { %434 = vmatpush3.bf16.msra.mxu0 %v482_v2  ;;  %442 = vmatpush3.bf16.msra.mxu1 %v485_v5  ;;  %v392_v26 = vld [vmem:[%s650_s4] ss:$0 sm:$0xff] }
   0x8   :  { %459 = vmatprep.subr.bf16.mxu0 %v498_v0  ;;  %443 = vmatprep.subr.bf16.mxu1 %v498_v0  ;;  %v496_v36 = vld [vmem:[%s651_s7] sm:$0xff]  }
   0x9   :  { %v401_v38 = vld [vmem:[%s652_s6] ss:$0 sm:$0xff] }
   0xa   :  { %436 = vmatmul.mubr.msk.bf16.vlgmr.msra.gmra.mrb[0].mxu0 %vm63_vm1, %v483_v4  ;;  %v407_v48 = vld [vmem:[%s653_s8] ss:$0 sm:$0xff] }
   0xb   :  { %467 = vmatprep.mubr.msk.bf16.mxu0 %vm499_vm0, %v498_v0  ;;  %444 = vmatpush3.bf16.msra.mxu1 %v486_v6 }
   0xc   :  { %445 = vmatprep.subr.bf16.mxu1 %v498_v0  ;;  %460 = vmatpush3.bf16.msra.mxu0 %v492_v12 }
   0xd   :  { %461 = vmatprep.subr.bf16.mxu0 %v498_v0 }
   0xf   :  { %446 = vmatpush3.bf16.msra.mxu1 %v487_v7 }
  0x10   :  { %447 = vmatprep.subr.bf16.mxu1 %v498_v0  ;;  %462 = vmatpush3.bf16.msra.mxu0 %v493_v13 }
  0x11   :  { %463 = vmatprep.subr.bf16.mxu0 %v498_v0 }
  0x13   :  { %448 = vmatpush3.bf16.msra.mxu1 %v488_v8 }
  0x14   :  { %449 = vmatprep.subr.bf16.mxu1 %v498_v0  ;;  %464 = vmatpush3.bf16.msra.mxu0 %v494_v24 }
  0x15   :  { %465 = vmatprep.subr.bf16.mxu0 %v498_v0 }
  0x17   :  { %450 = vmatpush3.bf16.msra.mxu1 %v489_v9 }
  0x18   :  { %451 = vmatprep.subr.bf16.mxu1 %v498_v0  ;;  %466 = vmatpush3.bf16.msra.mxu0 %v495_v25 }
  0x19   :  { %471 = vmatprep.subr.bf16.mxu0 %v498_v0 }
  0x1b   :  { %452 = vmatpush3.bf16.msra.mxu1 %v490_v10 }
  0x1c   :  { %453 = vmatprep.subr.bf16.mxu1 %v498_v0 }
  0x1f   :  { %454 = vmatpush3.bf16.msra.mxu1 %v491_v11 }
  0xdd   :  { %v101_v15 = vpop.f32.mrb[0].mxu0 }
  0xde   :  { %v102_v16 = vadd.f32 %v387_v14, %v101_v15  ;;  %v437_v17 = vpop.f32.mrb[1].mxu0 }
  0xdf   :  { %v104_v18 = vpop.f32.mrb[2].mxu0 }
  0xe0   :  { %v105_v19 = vadd.f32 %v387_v14, %v104_v18  ;;  %v438_v20 = vpop.f32.mrb[3].mxu0  ;;  %v108_v21 = vmax.f32 %v102_v16, 0.0 }
  0xe2   :  { %v109_v22 = vmax.f32 %v105_v19, 0.0 }
  0xe4   :  { %v110_v23 = vpack.c.bf16 %v109_v22, %v108_v21 }
  0xe6   :  { %456 = vmatmul.mubr.bf16.vlgmr.msra.gmra.mrb[0].mxu1 %v110_v23 }
 0x1b9   :  { %v216_v27 = vpop.f32.mrb[0].mxu1 }
 0x1ba   :  { %v217_v28 = vadd.f32 %v392_v26, %v216_v27  ;;  %v457_v29 = vpop.f32.mrb[1].mxu1 }
 0x1bb   :  { %v219_v30 = vpop.f32.mrb[2].mxu1 }
 0x1bc   :  { %v220_v31 = vadd.f32 %v392_v26, %v219_v30  ;;  %v458_v32 = vpop.f32.mrb[3].mxu1  ;;  %v223_v33 = vmax.f32 %v217_v28, 0.0 }
 0x1be   :  { %v224_v34 = vmax.f32 %v220_v31, 0.0 }
 0x1c0   :  { %v225_v35 = vpack.c.bf16 %v224_v34, %v223_v33 }
 0x1c2   :  { %468 = vmatmul.mubr.msk.bf16.vlgmr.msra.gmra.mrb[4].mxu0 %vm265_vm2, %v225_v35 }
 0x1c3   :  { %475 = vmatprep.mubr.msk.bf16.mxu0 %vm499_vm0, %v498_v0  ;;  %472 = vmatpush3.bf16.msra.mxu0 %v496_v36 }
 0x1c4   :  { %473 = vmatprep.subr.bf16.mxu0 %v498_v0 }
 0x1c7   :  { %474 = vmatpush3.bf16.msra.mxu0 %v497_v37 }
 0x295   :  { %v303_v39 = vpop.f32.mrb[4].mxu0 }
 0x296   :  { %v304_v40 = vadd.f32 %v401_v38, %v303_v39  ;;  %v469_v41 = vpop.f32.mrb[5].mxu0 }
 0x297   :  { %v306_v42 = vpop.f32.mrb[6].mxu0 }
 0x298   :  { %v307_v43 = vadd.f32 %v401_v38, %v306_v42  ;;  %v470_v44 = vpop.f32.mrb[7].mxu0  ;;  %v310_v45 = vmax.f32 %v304_v40, 0.0 }
 0x29a   :  { %v311_v46 = vmax.f32 %v307_v43, 0.0 }
 0x29c   :  { %v312_v47 = vpack.c.bf16 %v311_v46, %v310_v45 }
 0x29e   :  { %476 = vmatmul.mubr.msk.bf16.vlgmr.msra.gmra.mrb[8].mxu0 %vm63_vm1, %v312_v47 }
 0x371   :  { %v373_v49 = vpop.f32.mrb[8].mxu0 }
 0x372   :  { %v374_v50 = vadd.f32 %v407_v48, %v373_v49  ;;  %v477_v51 = vpop.f32.mrb[9].mxu0 }
 0x373   :  { %v376_v52 = vpop.f32.mrb[10].mxu0 }
 0x374   :  { %381 = vst.msk [vmem:[%s654_s9] sm:$0xff] %vm380_vm3, %v374_v50  ;;  %v377_v53 = vadd.f32 %v407_v48, %v376_v52  ;;  %v478_v54 = vpop.f32.mrb[11].mxu0 }
 0x376   :  { %382 = vst.msk [vmem:[%s654_s9 + $0x8] sm:$0xff] %vm380_vm3, %v377_v53 }

</bundles_post_ra>
